<compile_context>
chip_gen: v7x
topology: tpu7x:2x2x1
jax: 0.10.0
libtpu: 0.0.40
codegen_flags: <defaults>
</compile_context>

<pallas_src>
import numpy as np
import jax
import jax.numpy as jnp
from jax import lax
from jax.experimental import pallas as pl
from jax.experimental.pallas import tpu as pltpu

BN_EPS = 1e-5
HIDDEN = 32

_VMEM_LIMIT_BYTES = 48 * 1024 * 1024    # explicit scoped-VMEM request (fits v7x 64 MiB)
_TILE_BUDGET_BYTES = 32 * 1024 * 1024   # target for the pipelined x / output buffers
_MIN_GRID_STEPS = 16                    # keep both v7x TCs + double-buffering busy


def _round_up(x, m):
    return ((x + m - 1) // m) * m


def _choose_tile_n(n_pad, batch, per_lane_bytes, budget_bytes=_TILE_BUDGET_BYTES):
    """Largest lane-dense tile (multiple of 128 dividing n_pad) that fits the
    VMEM budget, shrunk while the grid would have too few steps."""
    cands = [t for t in range(128, n_pad + 1, 128) if n_pad % t == 0]
    if not cands:
        return n_pad
    max_tile = max(128, (budget_bytes // max(per_lane_bytes, 1)) // 128 * 128)
    fitting = [t for t in cands if t <= max_tile]
    tile = max(fitting) if fitting else cands[0]
    while tile > 128 and batch * (n_pad // tile) < _MIN_GRID_STEPS:
        smaller = [t for t in cands if t < tile]
        if not smaller:
            break
        tile = max(smaller)
    return tile


# --------------------------------------------------------------------------
# Pass 1: global input statistics (Gram matrix + column sums of x).
# --------------------------------------------------------------------------
def _stats_kernel(x_ref, gram_ref, xsum_ref):
    @pl.when(pl.program_id(1) == 0)
    def _():
        gram_ref[...] = jnp.zeros_like(gram_ref)
        xsum_ref[...] = jnp.zeros_like(xsum_ref)

    xb = x_ref[0]  # (C, TILE_N)
    # Contract on the lane axis of both operands (no transpose / XLU pass);
    # accumulate in f32 regardless of the matmul dtype.
    gram_ref[0] += lax.dot_general(xb, xb, (((1,), (1,)), ((), ())),
                                   preferred_element_type=jnp.float32)
    xsum_ref[0] += jnp.sum(xb.astype(jnp.float32), axis=1, keepdims=True)


def _stats_call(x, tile_n):
    B, C, N = x.shape
    grid = (B, N // tile_n)
    gram_p, xsum_p = pl.pallas_call(
        _stats_kernel,
        out_shape=(jax.ShapeDtypeStruct((B, C, C), jnp.float32),
                   jax.ShapeDtypeStruct((B, C, 1), jnp.float32)),
        grid=grid,
        in_specs=[pl.BlockSpec((1, C, tile_n), lambda b, n: (b, 0, n))],
        out_specs=(pl.BlockSpec((1, C, C), lambda b, n: (b, 0, 0)),
                   pl.BlockSpec((1, C, 1), lambda b, n: (b, 0, 0))),
        compiler_params=pltpu.CompilerParams(
            dimension_semantics=("parallel", "arbitrary"),
            vmem_limit_bytes=_VMEM_LIMIT_BYTES),
    )(x)
    # Tiny cross-batch reduction in XLA.
    return jnp.sum(gram_p, axis=0), jnp.sum(xsum_p, axis=0)


# --------------------------------------------------------------------------
# Pass 2: fused multi-head forward on (C_in, TILE_N) blocks.
# --------------------------------------------------------------------------
def _make_heads_kernel(offsets, parts):
    def kernel(x_ref, w1s_ref, shift_ref, w2t_ref, b2_ref, *o_refs):
        xb = x_ref[0]                                                 # (C, Tn)
        # Conv1d(C_in -> 32*num_classes) for all heads; BN scale is folded
        # into w1s, so only an add (shift) + ReLU remains.
        h = jnp.dot(w1s_ref[...], xb, preferred_element_type=jnp.float32)
        h = jnp.maximum(h + shift_ref[...], 0.0)                      # (H, Tn)
        # Block-diagonal Conv1d(32 -> P_i, bias=True) for all heads at once.
        out = jnp.dot(w2t_ref[...], h.astype(w2t_ref.dtype),
                      preferred_element_type=jnp.float32) + b2_ref[...]
        # Per-head lane-dense stores (no post-kernel slicing of a fused tensor).
        for o_ref, off, p in zip(o_refs, offsets, parts):
            o_ref[0] = out[off:off + p, :].astype(o_ref.dtype)
    return kernel


def _fused_heads_call(x, w1s, shift, w2t, b2, offsets, parts, tile_n, out_dtype):
    B, C, N = x.shape
    H_pad = w1s.shape[0]
    P_pad = w2t.shape[0]
    grid = (B, N // tile_n)
    M = B * N
    cost = pl.CostEstimate(
        flops=2 * M * C * H_pad + 2 * M * H_pad * P_pad + 4 * M * H_pad,
        transcendentals=0,
        bytes_accessed=(M * C * x.dtype.itemsize
                        + M * sum(parts) * jnp.dtype(out_dtype).itemsize
                        + w1s.size * w1s.dtype.itemsize
                        + w2t.size * w2t.dtype.itemsize))
    out_shape = tuple(jax.ShapeDtypeStruct((B, p, N), out_dtype) for p in parts)
    out_specs = tuple(pl.BlockSpec((1, p, tile_n), lambda b, n: (b, 0, n))
                      for p in parts)
    return pl.pallas_call(
        _make_heads_kernel(offsets, parts),
        out_shape=out_shape,
        grid=grid,
        in_specs=[
            pl.BlockSpec((1, C, tile_n), lambda b, n: (b, 0, n)),
            # Grid-invariant operands: constant index maps keep them resident.
            pl.BlockSpec((H_pad, C), lambda b, n: (0, 0)),
            pl.BlockSpec((H_pad, 1), lambda b, n: (0, 0)),
            pl.BlockSpec((P_pad, H_pad), lambda b, n: (0, 0)),
            pl.BlockSpec((P_pad, 1), lambda b, n: (0, 0)),
        ],
        out_specs=out_specs,
        compiler_params=pltpu.CompilerParams(
            dimension_semantics=("parallel", "parallel"),
            vmem_limit_bytes=_VMEM_LIMIT_BYTES),
        cost_estimate=cost,
    )(x, w1s, shift, w2t, b2)


# --------------------------------------------------------------------------
# Parameters and one-time fused-weight packing (hoisted out of the forward).
# --------------------------------------------------------------------------
def init_params(key, num_classes, in_channels, num_parts):
    """Deterministic synthetic parameters (shapes match the nn.Module)."""
    params = []
    for i in range(num_classes):
        key, k1, k2, k3 = jax.random.split(key, 4)
        p = num_parts[i]
        params.append(dict(
            # Conv1d(C, 32, 1, bias=False).weight (32, C, 1) stored as (C, 32).
            w1=0.1 * jax.random.normal(k1, (in_channels, HIDDEN), jnp.float32),
            # BatchNorm1d(32) default init.
            gamma=jnp.ones((HIDDEN,), jnp.float32),
            beta=jnp.zeros((HIDDEN,), jnp.float32),
            # Conv1d(32, P_i, 1, bias=True).weight (P_i, 32, 1) stored as (32, P_i).
            w2=0.1 * jax.random.normal(k2, (HIDDEN, p), jnp.float32),
            b2=0.1 * jax.random.normal(k3, (p,), jnp.float32),
        ))
    return params


def pack_params(params, in_channels, matmul_dtype=jnp.bfloat16):
    """Concatenate all heads into fused weights ONCE (host-side, numpy)."""
    parts = tuple(int(p["w2"].shape[1]) for p in params)
    H = HIDDEN * len(params)
    # H only needs sublane alignment; round to 128 only when already >= 128.
    H_pad = _round_up(H, 128) if H >= 128 else H
    P_pad = _round_up(sum(parts), 8)

    w1t = np.zeros((H_pad, in_channels), np.float32)
    gamma = np.zeros((H_pad, 1), np.float32)   # 0 on padded rows -> scale 0
    beta = np.zeros((H_pad, 1), np.float32)
    w2t = np.zeros((P_pad, H_pad), np.float32)  # block-diagonal
    b2 = np.zeros((P_pad, 1), np.float32)

    offsets = []
    po = 0
    for i, p in enumerate(params):
        ho = HIDDEN * i
        pi = parts[i]
        w1t[ho:ho + HIDDEN, :] = np.asarray(p["w1"]).T
        gamma[ho:ho + HIDDEN, 0] = np.asarray(p["gamma"])
        beta[ho:ho + HIDDEN, 0] = np.asarray(p["beta"])
        w2t[po:po + pi, ho:ho + HIDDEN] = np.asarray(p["w2"]).T
        b2[po:po + pi, 0] = np.asarray(p["b2"])
        offsets.append(po)
        po += pi

    return dict(
        w1t=jnp.asarray(w1t),                          # f32: BN stats + fold
        gamma=jnp.asarray(gamma),
        beta=jnp.asarray(beta),
        w2t=jnp.asarray(w2t).astype(matmul_dtype),
        b2=jnp.asarray(b2),
        offsets=tuple(offsets),
        parts=parts,
        matmul_dtype=matmul_dtype,
    )


def multi_part_seg_head_forward(end_points, fused, out_dtype=jnp.float32):
    """end_points: (B, C_in, N) -> list of (B, num_parts[i], N) logits."""
    B, C, N = end_points.shape
    mm_dtype = fused["matmul_dtype"]
    w1t = fused["w1t"]
    w2t = fused["w2t"]
    H_pad, P_pad = w1t.shape[0], w2t.shape[0]

    # Pad N to a multiple of 128: lane-dense stores + bounded VMEM. The padded
    # zero columns add nothing to the BN sums (we divide by the real M below).
    n_pad = _round_up(N, 128)
    x = end_points
    if n_pad != N:
        x = jnp.pad(x, ((0, 0), (0, 0), (0, n_pad - N)))
    x = x.astype(mm_dtype)

    # VMEM-budget-driven lane tile.
    mm_bytes = jnp.dtype(mm_dtype).itemsize
    out_bytes = jnp.dtype(out_dtype).itemsize
    weight_bytes = 2 * (H_pad * C + P_pad * H_pad) * mm_bytes + (H_pad + P_pad) * 8
    per_lane = 2 * C * mm_bytes + 2 * P_pad * out_bytes + (H_pad + P_pad) * 4
    budget = max(_TILE_BUDGET_BYTES - weight_bytes, 4 * 1024 * 1024)
    tile_n = _choose_tile_n(n_pad, B, per_lane, budget)

    # Pass 1: tiny global reductions -> exact training-mode BN statistics.
    gram, xsum = _stats_call(x, tile_n)
    M = B * N
    mean_x = xsum / M                                   # (C, 1)
    exx = gram / M                                      # (C, C)  E[x xᵀ]
    mean_h = jnp.dot(w1t, mean_x)                       # (H_pad, 1)
    eh2 = jnp.sum(jnp.dot(w1t, exx) * w1t, axis=1, keepdims=True)
    # TODO(synk): E[h²]−mean² can cancel in f32 when |mean| ≫ std; clamped at 0.
    var_h = jnp.maximum(eh2 - mean_h * mean_h, 0.0)     # biased var
    scale = fused["gamma"] * lax.rsqrt(var_h + BN_EPS)
    shift = fused["beta"] - mean_h * scale
    w1s = (w1t * scale).astype(mm_dtype)                # fold BN scale into W1

    # Pass 2: fused heads, one streaming read of x, per-head lane-dense stores.
    outs = _fused_heads_call(x, w1s, shift, w2t, fused["b2"],
                             fused["offsets"], fused["parts"], tile_n, out_dtype)
    if n_pad != N:
        outs = tuple(o[:, :, :N] for o in outs)
    return list(outs)


# --------------------------------------------------------------------------
# Pure-JAX reference (matches the PyTorch forward) for correctness checks.
# --------------------------------------------------------------------------
def _reference_forward(end_points, params):
    outs = []
    for p in params:
        h = jnp.einsum("bcn,ch->bhn", end_points, p["w1"])
        mean = jnp.mean(h, axis=(0, 2), keepdims=True)
        var = jnp.mean((h - mean) ** 2, axis=(0, 2), keepdims=True)
        hn = (h - mean) * lax.rsqrt(var + BN_EPS)
        hn = hn * p["gamma"][None, :, None] + p["beta"][None, :, None]
        ha = jnp.maximum(hn, 0.0)
        outs.append(jnp.einsum("bhn,hp->bpn", ha, p["w2"])
                    + p["b2"][None, :, None])
    return outs


if __name__ == "__main__":
    # Small, module-consistent shapes.
    B, C_IN, N = 2, 4, 16
    NUM_CLASSES = 3
    NUM_PARTS = [2, 3, 4]

    key = jax.random.PRNGKey(0)
    key, xkey = jax.random.split(key)
    end_points = jax.random.normal(xkey, (B, C_IN, N), jnp.float32)
    params = init_params(key, NUM_CLASSES, C_IN, NUM_PARTS)

    ref = _reference_forward(end_points, params)

    # f32 matmul path: strict parity with the training-mode reference.
    fused_f32 = pack_params(params, C_IN, matmul_dtype=jnp.float32)
    fwd_f32 = jax.jit(lambda x: multi_part_seg_head_forward(x, fused_f32))
    logits = [jax.block_until_ready(l) for l in fwd_f32(end_points)]
    for i, (l, r) in enumerate(zip(logits, ref)):
        assert l.shape == (B, NUM_PARTS[i], N), l.shape
        assert bool(jnp.all(jnp.isfinite(l)))
        max_diff = float(jnp.max(jnp.abs(l - r)))
        assert max_diff < 1e-3, f"f32 head {i}: max |diff| = {max_diff}"

    # Default bf16 matmul path (f32 accumulation + f32 BN math): loose parity.
    fused_bf16 = pack_params(params, C_IN)  # matmul_dtype=bf16 by default
    fwd_bf16 = jax.jit(lambda x: multi_part_seg_head_forward(x, fused_bf16))
    logits_bf = [jax.block_until_ready(l) for l in fwd_bf16(end_points)]
    for i, (l, r) in enumerate(zip(logits_bf, ref)):
        assert l.shape == (B, NUM_PARTS[i], N), l.shape
        assert bool(jnp.all(jnp.isfinite(l)))
        max_diff = float(jnp.max(jnp.abs(l - r)))
        assert max_diff < 1e-1, f"bf16 head {i}: max |diff| = {max_diff}"

    print("KERNEL_OK")
</pallas_src>

<mosaic_0001>
module attributes {stable_mosaic.version = 11 : i64} {
  func.func @_stats_kernel(%arg0: i32, %arg1: i32, %arg2: memref<1x4x128xf32, #tpu.memory_space<vmem>>, %arg3: memref<1x4x4xf32, #tpu.memory_space<vmem>>, %arg4: memref<1x4x1xf32, #tpu.memory_space<vmem>>) attributes {dimension_semantics = [#tpu.dimension_semantics<parallel>, #tpu.dimension_semantics<arbitrary>], iteration_bounds = array<i64: 2, 1>, scalar_prefetch = 0 : i64, scratch_operands = 0 : i64, tpu.core_type = #tpu.core_type<tc>, window_params = [{transform_indices = @transform_0, window_bounds = array<i64: 1, 4, 128>}, {transform_indices = @transform_1, window_bounds = array<i64: 1, 4, 4>}, {transform_indices = @transform_2, window_bounds = array<i64: 1, 4, 1>}]} {
    %c0_i32 = arith.constant 0 : i32
    %0 = arith.cmpi eq, %arg1, %c0_i32 : i32
    %1 = arith.extui %0 : i1 to i32
    %c0_i32_0 = arith.constant 0 : i32
    %2 = arith.cmpi ne, %1, %c0_i32_0 : i32
    scf.if %2 {
      %cst_16 = arith.constant 0.000000e+00 : f32
      %20 = vector.broadcast %cst_16 : f32 to vector<1x4x4xf32>
      %c0_17 = arith.constant 0 : index
      %c0_18 = arith.constant 0 : index
      %c0_19 = arith.constant 0 : index
      %21 = vector.load %arg3[%c0_17, %c0_18, %c0_19] : memref<1x4x4xf32, #tpu.memory_space<vmem>>, vector<1x4x4xf32>
      tpu.vector_store %arg3[%c0_17, %c0_18, %c0_19], %20 {strides = array<i32>} : memref<1x4x4xf32, #tpu.memory_space<vmem>>, vector<1x4x4xf32>,
      %cst_20 = arith.constant 0.000000e+00 : f32
      %22 = vector.broadcast %cst_20 : f32 to vector<1x4x1xf32>
      %c0_21 = arith.constant 0 : index
      %c0_22 = arith.constant 0 : index
      %c0_23 = arith.constant 0 : index
      %23 = vector.load %arg4[%c0_21, %c0_22, %c0_23] : memref<1x4x1xf32, #tpu.memory_space<vmem>>, vector<1x4x1xf32>
      tpu.vector_store %arg4[%c0_21, %c0_22, %c0_23], %22 {strides = array<i32>} : memref<1x4x1xf32, #tpu.memory_space<vmem>>, vector<1x4x1xf32>,
    } else {
    }
    %c0 = arith.constant 0 : index
    %c0_1 = arith.constant 0 : index
    %c0_2 = arith.constant 0 : index
    %3 = vector.load %arg2[%c0, %c0_1, %c0_2] : memref<1x4x128xf32, #tpu.memory_space<vmem>>, vector<1x4x128xf32>
    %4 = vector.shape_cast %3 : vector<1x4x128xf32> to vector<4x128xf32>
    %c0_3 = arith.constant 0 : index
    %c0_4 = arith.constant 0 : index
    %c0_5 = arith.constant 0 : index
    %5 = vector.load %arg3[%c0_3, %c0_4, %c0_5] : memref<1x4x4xf32, #tpu.memory_space<vmem>>, vector<1x4x4xf32>
    %6 = vector.shape_cast %5 : vector<1x4x4xf32> to vector<4x4xf32>
    %cst = arith.constant dense<0.000000e+00> : vector<4x4xf32>
    %7 = tpu.matmul %4, %4, %cst {dimension_numbers = #tpu.dot_dimension_numbers<[1], [1], [0], [0], [0, 0, 1, 0], [], []>} : vector<4x128xf32>, vector<4x128xf32>, vector<4x4xf32> -> vector<4x4xf32>
    %8 = arith.addf %6, %7 : vector<4x4xf32>
    %c0_6 = arith.constant 0 : index
    %c0_7 = arith.constant 0 : index
    %c0_8 = arith.constant 0 : index
    %9 = vector.load %arg3[%c0_6, %c0_7, %c0_8] : memref<1x4x4xf32, #tpu.memory_space<vmem>>, vector<1x4x4xf32>
    %10 = vector.shape_cast %9 : vector<1x4x4xf32> to vector<4x4xf32>
    %11 = vector.shape_cast %8 : vector<4x4xf32> to vector<1x4x4xf32>
    tpu.vector_store %arg3[%c0_6, %c0_7, %c0_8], %11 {strides = array<i32>} : memref<1x4x4xf32, #tpu.memory_space<vmem>>, vector<1x4x4xf32>,
    %c0_9 = arith.constant 0 : index
    %c0_10 = arith.constant 0 : index
    %c0_11 = arith.constant 0 : index
    %12 = vector.load %arg4[%c0_9, %c0_10, %c0_11] : memref<1x4x1xf32, #tpu.memory_space<vmem>>, vector<1x4x1xf32>
    %13 = vector.shape_cast %12 : vector<1x4x1xf32> to vector<4x1xf32>
    %cst_12 = arith.constant dense<0.000000e+00> : vector<4xf32>
    %14 = vector.multi_reduction <add>, %4, %cst_12 [1] : vector<4x128xf32> to vector<4xf32>
    %15 = vector.shape_cast %14 : vector<4xf32> to vector<4x1xf32>
    %16 = arith.addf %13, %15 : vector<4x1xf32>
    %c0_13 = arith.constant 0 : index
    %c0_14 = arith.constant 0 : index
    %c0_15 = arith.constant 0 : index
    %17 = vector.load %arg4[%c0_13, %c0_14, %c0_15] : memref<1x4x1xf32, #tpu.memory_space<vmem>>, vector<1x4x1xf32>
    %18 = vector.shape_cast %17 : vector<1x4x1xf32> to vector<4x1xf32>
    %19 = vector.shape_cast %16 : vector<4x1xf32> to vector<1x4x1xf32>
    tpu.vector_store %arg4[%c0_13, %c0_14, %c0_15], %19 {strides = array<i32>} : memref<1x4x1xf32, #tpu.memory_space<vmem>>, vector<1x4x1xf32>,
    return
  }
  func.func @transform_0(%arg0: i32, %arg1: i32) -> (i32, i32, i32) {
    %c0_i32 = arith.constant 0 : i32
    %c0_i32_0 = arith.constant 0 : i32
    return %arg0, %c0_i32, %arg1 : i32, i32, i32
  }
  func.func @transform_1(%arg0: i32, %arg1: i32) -> (i32, i32, i32) {
    %c0_i32 = arith.constant 0 : i32
    %c0_i32_0 = arith.constant 0 : i32
    %c0_i32_1 = arith.constant 0 : i32
    return %arg0, %c0_i32, %c0_i32_0 : i32, i32, i32
  }
  func.func @transform_2(%arg0: i32, %arg1: i32) -> (i32, i32, i32) {
    %c0_i32 = arith.constant 0 : i32
    %c0_i32_0 = arith.constant 0 : i32
    %c0_i32_1 = arith.constant 0 : i32
    return %arg0, %c0_i32, %c0_i32_0 : i32, i32, i32
  }
}

module attributes {stable_mosaic.version = 11 : i64} {
  func.func @kernel(%arg0: i32, %arg1: i32, %arg2: memref<1x4x128xf32, #tpu.memory_space<vmem>>, %arg3: memref<96x4xf32, #tpu.memory_space<vmem>>, %arg4: memref<96x1xf32, #tpu.memory_space<vmem>>, %arg5: memref<16x96xf32, #tpu.memory_space<vmem>>, %arg6: memref<16x1xf32, #tpu.memory_space<vmem>>, %arg7: memref<1x2x128xf32, #tpu.memory_space<vmem>>, %arg8: memref<1x3x128xf32, #tpu.memory_space<vmem>>, %arg9: memref<1x4x128xf32, #tpu.memory_space<vmem>>) attributes {dimension_semantics = [#tpu.dimension_semantics<parallel>, #tpu.dimension_semantics<parallel>], iteration_bounds = array<i64: 2, 1>, scalar_prefetch = 0 : i64, scratch_operands = 0 : i64, tpu.core_type = #tpu.core_type<tc>, window_params = [{transform_indices = @transform_0, window_bounds = array<i64: 1, 4, 128>}, {pipeline_mode = #tpu.pipeline_mode<synchronous>, transform_indices = @transform_1, window_bounds = array<i64: 96, 4>}, {pipeline_mode = #tpu.pipeline_mode<synchronous>, transform_indices = @transform_2, window_bounds = array<i64: 96, 1>}, {pipeline_mode = #tpu.pipeline_mode<synchronous>, transform_indices = @transform_3, window_bounds = array<i64: 16, 96>}, {pipeline_mode = #tpu.pipeline_mode<synchronous>, transform_indices = @transform_4, window_bounds = array<i64: 16, 1>}, {transform_indices = @transform_5, window_bounds = array<i64: 1, 2, 128>}, {transform_indices = @transform_6, window_bounds = array<i64: 1, 3, 128>}, {transform_indices = @transform_7, window_bounds = array<i64: 1, 4, 128>}]} {
    %c0 = arith.constant 0 : index
    %c0_0 = arith.constant 0 : index
    %c0_1 = arith.constant 0 : index
    %0 = vector.load %arg2[%c0, %c0_0, %c0_1] : memref<1x4x128xf32, #tpu.memory_space<vmem>>, vector<1x4x128xf32>
    %1 = vector.shape_cast %0 : vector<1x4x128xf32> to vector<4x128xf32>
    %c0_2 = arith.constant 0 : index
    %c0_3 = arith.constant 0 : index
    %2 = vector.load %arg3[%c0_2, %c0_3] : memref<96x4xf32, #tpu.memory_space<vmem>>, vector<96x4xf32>
    %cst = arith.constant dense<0.000000e+00> : vector<96x128xf32>
    %3 = tpu.matmul %2, %1, %cst {dimension_numbers = #tpu.dot_dimension_numbers<[1], [0], [0], [1], [0, 0, 1, 1], [], []>} : vector<96x4xf32>, vector<4x128xf32>, vector<96x128xf32> -> vector<96x128xf32>
    %c0_4 = arith.constant 0 : index
    %c0_5 = arith.constant 0 : index
    %4 = vector.load %arg4[%c0_4, %c0_5] : memref<96x1xf32, #tpu.memory_space<vmem>>, vector<96x1xf32>
    %5 = vector.broadcast %4 : vector<96x1xf32> to vector<96x128xf32>
    %6 = arith.addf %3, %5 : vector<96x128xf32>
    %cst_6 = arith.constant 0.000000e+00 : f32
    %7 = vector.broadcast %cst_6 : f32 to vector<96x128xf32>
    %8 = arith.maximumf %6, %7 : vector<96x128xf32>
    %c0_7 = arith.constant 0 : index
    %c0_8 = arith.constant 0 : index
    %9 = vector.load %arg5[%c0_7, %c0_8] : memref<16x96xf32, #tpu.memory_space<vmem>>, vector<16x96xf32>
    %cst_9 = arith.constant dense<0.000000e+00> : vector<16x128xf32>
    %10 = tpu.matmul %9, %8, %cst_9 {dimension_numbers = #tpu.dot_dimension_numbers<[1], [0], [0], [1], [0, 0, 1, 1], [], []>} : vector<16x96xf32>, vector<96x128xf32>, vector<16x128xf32> -> vector<16x128xf32>
    %c0_10 = arith.constant 0 : index
    %c0_11 = arith.constant 0 : index
    %11 = vector.load %arg6[%c0_10, %c0_11] : memref<16x1xf32, #tpu.memory_space<vmem>>, vector<16x1xf32>
    %12 = vector.broadcast %11 : vector<16x1xf32> to vector<16x128xf32>
    %13 = arith.addf %10, %12 : vector<16x128xf32>
    %14 = vector.extract_strided_slice %13 {offsets = [0, 0], sizes = [2, 128], strides = [1, 1]} : vector<16x128xf32> to vector<2x128xf32>
    %c0_12 = arith.constant 0 : index
    %c0_13 = arith.constant 0 : index
    %c0_14 = arith.constant 0 : index
    %15 = vector.load %arg7[%c0_12, %c0_13, %c0_14] : memref<1x2x128xf32, #tpu.memory_space<vmem>>, vector<1x2x128xf32>
    %16 = vector.shape_cast %15 : vector<1x2x128xf32> to vector<2x128xf32>
    %17 = vector.shape_cast %14 : vector<2x128xf32> to vector<1x2x128xf32>
    tpu.vector_store %arg7[%c0_12, %c0_13, %c0_14], %17 {strides = array<i32>} : memref<1x2x128xf32, #tpu.memory_space<vmem>>, vector<1x2x128xf32>,
    %18 = vector.extract_strided_slice %13 {offsets = [2, 0], sizes = [3, 128], strides = [1, 1]} : vector<16x128xf32> to vector<3x128xf32>
    %c0_15 = arith.constant 0 : index
    %c0_16 = arith.constant 0 : index
    %c0_17 = arith.constant 0 : index
    %19 = vector.load %arg8[%c0_15, %c0_16, %c0_17] : memref<1x3x128xf32, #tpu.memory_space<vmem>>, vector<1x3x128xf32>
    %20 = vector.shape_cast %19 : vector<1x3x128xf32> to vector<3x128xf32>
    %21 = vector.shape_cast %18 : vector<3x128xf32> to vector<1x3x128xf32>
    tpu.vector_store %arg8[%c0_15, %c0_16, %c0_17], %21 {strides = array<i32>} : memref<1x3x128xf32, #tpu.memory_space<vmem>>, vector<1x3x128xf32>,
    %22 = vector.extract_strided_slice %13 {offsets = [5, 0], sizes = [4, 128], strides = [1, 1]} : vector<16x128xf32> to vector<4x128xf32>
    %c0_18 = arith.constant 0 : index
    %c0_19 = arith.constant 0 : index
    %c0_20 = arith.constant 0 : index
    %23 = vector.load %arg9[%c0_18, %c0_19, %c0_20] : memref<1x4x128xf32, #tpu.memory_space<vmem>>, vector<1x4x128xf32>
    %24 = vector.shape_cast %23 : vector<1x4x128xf32> to vector<4x128xf32>
    %25 = vector.shape_cast %22 : vector<4x128xf32> to vector<1x4x128xf32>
    tpu.vector_store %arg9[%c0_18, %c0_19, %c0_20], %25 {strides = array<i32>} : memref<1x4x128xf32, #tpu.memory_space<vmem>>, vector<1x4x128xf32>,
    return
  }
  func.func @transform_0(%arg0: i32, %arg1: i32) -> (i32, i32, i32) {
    %c0_i32 = arith.constant 0 : i32
    %c0_i32_0 = arith.constant 0 : i32
    return %arg0, %c0_i32, %arg1 : i32, i32, i32
  }
  func.func @transform_1(%arg0: i32, %arg1: i32) -> (i32, i32) {
    %c0_i32 = arith.constant 0 : i32
    %c0_i32_0 = arith.constant 0 : i32
    %c0_i32_1 = arith.constant 0 : i32
    return %c0_i32, %c0_i32_0 : i32, i32
  }
  func.func @transform_2(%arg0: i32, %arg1: i32) -> (i32, i32) {
    %c0_i32 = arith.constant 0 : i32
    %c0_i32_0 = arith.constant 0 : i32
    %c0_i32_1 = arith.constant 0 : i32
    return %c0_i32, %c0_i32_0 : i32, i32
  }
  func.func @transform_3(%arg0: i32, %arg1: i32) -> (i32, i32) {
    %c0_i32 = arith.constant 0 : i32
    %c0_i32_0 = arith.constant 0 : i32
    %c0_i32_1 = arith.constant 0 : i32
    return %c0_i32, %c0_i32_0 : i32, i32
  }
  func.func @transform_4(%arg0: i32, %arg1: i32) -> (i32, i32) {
    %c0_i32 = arith.constant 0 : i32
    %c0_i32_0 = arith.constant 0 : i32
    %c0_i32_1 = arith.constant 0 : i32
    return %c0_i32, %c0_i32_0 : i32, i32
  }
  func.func @transform_5(%arg0: i32, %arg1: i32) -> (i32, i32, i32) {
    %c0_i32 = arith.constant 0 : i32
    %c0_i32_0 = arith.constant 0 : i32
    return %arg0, %c0_i32, %arg1 : i32, i32, i32
  }
  func.func @transform_6(%arg0: i32, %arg1: i32) -> (i32, i32, i32) {
    %c0_i32 = arith.constant 0 : i32
    %c0_i32_0 = arith.constant 0 : i32
    return %arg0, %c0_i32, %arg1 : i32, i32, i32
  }
  func.func @transform_7(%arg0: i32, %arg1: i32) -> (i32, i32, i32) {
    %c0_i32 = arith.constant 0 : i32
    %c0_i32_0 = arith.constant 0 : i32
    return %arg0, %c0_i32, %arg1 : i32, i32, i32
  }
}

</mosaic_0001>

<bundles_post_ra>
// kernel: _lambda_.2
= control target key start
LH: loop header
LB: loop body
LE: loop exit
PB: predicated region body
PF: predicated region fallthrough
CT: control target
= control target key end

     0   :  { %s443_s9 = smov 0   ;;  %s445_s10 = smov 0   ;;  %s481_s0 = inlined_call_operand.vmem [shape: f32[2,4,128], index: 0, kind: input, shape index: {}]   ;;  %s482_s1 = inlined_call_operand.vmem [shape: f32[2,4,4], index: 1, kind: output, shape index: {0}]   ;;  %s483_s2 = inlined_call_operand.vmem [shape: f32[2,4,1], index: 2, kind: output, shape index: {1}]  }
   0x1   :  { %s447_s11 = smov 0  }
   0x2 LB: > { %s25_s12 = sadd.s32 1, %s420_s10  ;;  %p363_p0 = scmp.ge.s32.totalorder %s424_s11, 1  ;;  %s424_s11 = sphi %s447_s11, %s13_s11   ;;  %s420_s10 = sphi %s445_s10, %s485_s10   ;;  %s416_s9 = sphi %s443_s9, %s484_s9  }
   0x3   : > { %p27_p1 = scmp.ge.s32.totalorder %s25_s12, 2  ;;  %p131_p2 = scmp.lt.s32.totalorder %s424_s11, 3 }
   0x5   : > { %s487_s12 = smov (%p27_p1, %s25_s12), 0  ;;  %p132_p3 = pnand %p363_p0, %p131_p2 }
   0x6   : > { %p158_p4 = scmp.lt.s32.totalorder (!%p132_p3), %s416_s9, 1  ;;  %v426_v0 = vmov (!%p132_p3), 0.0   ;;  %vm427_vm0 = vmmov (!%p132_p3), 0   ;;  %vm177_vm1 = vcmask (!%p132_p3), 27648   ;;  %vm257_vm2 = vcmask (!%p132_p3), 1043456  }
   0x7   : > { %135 = sbr.rel (%p132_p3) target bundleno = 236 (0xec), region = 24  ;;  %371 = vmatprep.subr.mxu0 (!%p132_p3), %v426_v0  ;;  %373 = vmatprep.mubr.msk.f32.mxu0 (!%p132_p3), %vm427_vm0, %v426_v0  ;;  %vm179_vm3 = vcmask (!%p132_p3), 3072  }
   0xe   : > { %s489_s9 = smov (!%p158_p4, %s416_s9), 1 }
   0xf   : > { %s364_s13 = sshll.u32 %s489_s9, 2 }
  0x10   : > { %s164_s16 = scalar_lea.vmem %s481_s0, %s364_s13  ;;  %s168_s19 = scalar_lea.vmem %s482_s1, %s364_s13 }
  0x11   : > { %v181_v1 = vld [vmem:[%s164_s16] sm:$0xf]  ;;  %178 = vst.msk [vmem:[%s168_s19] sm:$0xf] %vm177_vm1, %v426_v0  ;;  %s172_s22 = scalar_lea.vmem %s483_s2, %s364_s13 }
  0x12   : > { %372 = vmatpush3.xpose.msra.mxu0 %v181_v1  ;;  %v258_v2 = vsel %vm257_vm2, %v181_v1, 0.0  ;;  %180 = vst.msk [vmem:[%s172_s22] sm:$0xf] %vm179_vm3, %v426_v0 }
  0x13   : > { %259 = vadd.xlane.f32.xlu0 %v258_v2 }
  0x15   : > { %374 = vmatmul.mubr.f32.vlgmr.msra.gmra.mrb[0].mxu0 %v181_v1 }
  0x18   : > { %v182_v6 = vld [vmem:[%s168_s19] sm:$0xf] }
  0x19   : > { %v256_v3 = vld [vmem:[%s172_s22] sm:$0xf] }
  0xa0   : > { %v260_v4 = vpop.xlane.xlu0 %259 }
  0xa1   : > { %v261_v5 = vadd.f32 %v260_v4, %v256_v3 }
  0xa3   : > { %263 = vst.msk [vmem:[%s172_s22] sm:$0xf] %vm179_vm3, %v261_v5 }
  0xe8   : > { %v249_v7 = vpop.f32.mrb[0].mxu0 }
  0xe9   : > { %v253_v8 = vadd.f32 %v249_v7, %v182_v6  ;;  %v375_v9 = vpop.f32.mrb[1].mxu0 }
  0xeb   : > { %255 = vst.msk [vmem:[%s168_s19] sm:$0xf] %vm177_vm1, %v253_v8 }
  0xec PF: > { %s13_s11 = sadd.s32 1, %s424_s11   ;;  %s484_s9 = smov %s420_s10 }
  0xed   : > { %p10_p5 = scmp.ge.s32.totalorder %s13_s11, 4   ;;  %s485_s10 = smov %s487_s12 }
  0xef   :  { %12 = sbr.rel (!%p10_p5) target bundleno = 2 (0x2), region = 70 }

// kernel: _lambda_.3
= control target key start
LH: loop header
LB: loop body
LE: loop exit
PB: predicated region body
PF: predicated region fallthrough
CT: control target
= control target key end

     0   :  { %s1473_s0 = inlined_call_operand.vmem [shape: f32[2,4,128], index: 0, kind: input, shape index: {}]   ;;  %s1474_s1 = inlined_call_operand.vmem [shape: f32[96,4], index: 1, kind: input, shape index: {}]   ;;  %s1475_s2 = inlined_call_operand.vmem [shape: f32[96,1], index: 2, kind: input, shape index: {}]   ;;  %s1476_s3 = inlined_call_operand.vmem [shape: f32[16,96], index: 3, kind: input, shape index: {}]   ;;  %s1477_s4 = inlined_call_operand.vmem [shape: f32[16,1], index: 4, kind: input, shape index: {}]   ;;  %s1478_s5 = inlined_call_operand.hbm [shape: f32[2,2,128], index: 5, kind: output, shape index: {0}]   ;;  %s1479_s6 = inlined_call_operand.vmem [shape: f32[2,3,128], index: 6, kind: output, shape index: {1}]   ;;  %s1480_s7 = inlined_call_operand.hbm [shape: f32[2,4,128], index: 7, kind: output, shape index: {2}]  }
   0x1   :  { %1481 = sst [smem:[#allocation8_spill]] %s1473_s0 }
   0x2   :  { %1482 = sst [smem:[#allocation9_spill]] %s1474_s1 }
   0x3   :  { %1483 = sst [smem:[#allocation10_spill]] %s1475_s2 }
   0x4   :  { %13 = vsyncpa [#allocation3], 0 }
   0x5   :  { %15 = vsyncpa [#allocation3 + $0x1], 0 }
   0x6   :  { %16 = vsyncpa [#allocation5], 0 }
   0x7   :  { %18 = vsyncpa [#allocation5 + $0x1], 0  ;;  %s1218_s24 = smov 0   ;;  %s1220_s25 = smov 0  }
   0x8   :  { %s1222_s26 = smov 0   ;;  %s1224_s27 = smov 0  }
   0x9   :  { %s1226_s28 = smov 0   ;;  %s1228_s29 = smov 0  }
   0xa LB: > { %s872_s30 = sadd.s32 4294967295, %s1173_s29   ;;  %s873_s8 = sadd.s32 4294967294, %s1173_s29   ;;  %s1173_s29 = sphi %s1228_s29, %s24_s29   ;;  %s1169_s28 = sphi %s1226_s28, %s1493_s28   ;;  %s1165_s27 = sphi %s1224_s27, %s1492_s27   ;;  %s1161_s26 = sphi %s1222_s26, %s1491_s26   ;;  %s1157_s25 = sphi %s1220_s25, %s1490_s25   ;;  %s1153_s24 = sphi %s1218_s24, %s1489_s24  }
   0xb   : > { %s36_s9 = sadd.s32 1, %s1169_s28  ;;  %s157_s10 = sadd.s32 1, %s1161_s26 }
   0xc   : > { %p38_p0 = scmp.ge.s32.totalorder %s36_s9, 2  ;;  %p167_p1 = scmp.ne.s32.totalorder %s1161_s26, %s1157_s25 }
   0xd   : > { %p168_p2 = scmp.eq.s32.totalorder %s872_s30, 1  ;;  %p173_p3 = scmp.ne.s32.totalorder %s1157_s25, %s1153_s24 }
   0xe   : > { %s1495_s9 = smov (%p38_p0, %s36_s9), 0  ;;  %p174_p5 = scmp.eq.s32.totalorder %s873_s8, 1 }
   0xf   : > { %p1258_p4 = por %p168_p2, %p167_p1  ;;  %s152_s12 = ssub.s32 %s1169_s28, %s1495_s9 }
  0x10   : > { %p876_p6 = scmp.ge.s32.totalorder %s1173_s29, 1  ;;  %p155_p7 = scmp.eq.s32.totalorder %s152_s12, 0 }
  0x11   : > { %p1265_p8 = por %p174_p5, %p173_p3  ;;  %p270_p9 = scmp.lt.s32.totalorder %s1173_s29, 3 }
  0x12   : > { %s1271_s14 = scalar_select %p155_p7, %s1161_s26, %s157_s10  }
  0x13   : > { %p271_p10 = pnand %p876_p6, %p270_p9 }
  0x14   : > { %p316_p11 = scmp.lt.s32.totalorder (!%p271_p10), %s1165_s27, 1  ;;  %s1486_s1 = sld [smem:[#allocation9_spill]] (!%p271_p10)  ;;  %vm415_vm0 = vcmask (!%p271_p10), 31744   ;;  %v1175_v1 = vmov (!%p271_p10), 0   ;;  %vm452_vm1 = vcmask (!%p271_p10), 1043456   ;;  %v595_v26 = vld [vmem:[%s1477_s4] sm:$0xff] (!%p271_p10) }
  0x15   : > { %274 = sbr.rel (%p271_p10) target bundleno = 531 (0x213), region = 40  ;;  %1061 = vset.pattern.permute.xlu0 (!%p271_p10), %v1175_v1  ;;  %1062 = vset.pattern.permute.xlu1 (!%p271_p10), %v1175_v1  ;;  %s1487_s2 = sld [smem:[#allocation10_spill]] (!%p271_p10)  ;;  %v596_v27 = vld [vmem:[%s1477_s4 + $0x8] sm:$0xff] (!%p271_p10)  ;;  %v593_v28 = vld [vmem:[%s1476_s3] sm:$0xff] (!%p271_p10)  ;;  %vm607_vm2 = vcmask (!%p271_p10), 785408  }
  0x16   : > { %s1488_s0 = sld [smem:[#allocation8_spill]] (!%p271_p10)  ;;  %973 = vmatprep.mubr.msk.f32.mxu1 (!%p271_p10), %vm607_vm2, %v593_v28  ;;  %s1382_s21 = sand.u32 (!%p271_p10), 1, %s1157_s25  }
  0x17   : > { %s877_s22 = sshll.u32 (!%p271_p10), %s1382_s21, 1  ;;  %s878_s23 = sshll.u32 (!%p271_p10), %s1382_s21, 2 }
  0x18   : > { %s898_s30 = sshll.u32 (!%p271_p10), %s1165_s27, 5  ;;  %s299_s15 = scalar_lea.vmem (!%p271_p10), [#allocation2], %s877_s22 }
  0x19   : > { %s720_s16 = sshll.u32 (!%p271_p10), %s299_s15, 4  ;;  %s899_s19 = sshll.u32 (!%p271_p10), %s1165_s27, 6  ;;  %s1398_s16 = int_to_ptr.vmem [resolvable:$true] %s720_s16 }
  0x1a   : > { %v331_v0 = vld [vmem:[%s1486_s1] sm:$0xff] (!%p271_p10)  ;;  %v332_v5 = vld [vmem:[%s1486_s1 + $0x8] sm:$0xff] (!%p271_p10)  ;;  %v333_v7 = vld [vmem:[%s1486_s1 + $0x10] sm:$0xff] (!%p271_p10)  ;;  %s315_s20 = scalar_lea.vmem (!%p271_p10), [#allocation4], %s878_s23  ;;  %s1403_s22 = scalar_lea.hbm (!%p271_p10), %s1480_s7, %s899_s19 }
  0x1b   : > { %931 = vmatprep.mubr.msk.f32.mxu0 (!%p271_p10), %vm415_vm0, %v331_v0  ;;  %v343_v2 = vld [vmem:[%s1487_s2] sm:$0xff] (!%p271_p10)  ;;  %v345_v3 = vld [vmem:[%s1487_s2 + $0x10] sm:$0xff] (!%p271_p10)  ;;  %v344_v6 = vld [vmem:[%s1487_s2 + $0x8] sm:$0xff] (!%p271_p10)  ;;  %s1176_s23 = smov (!%p271_p10), [#allocation2]  }
  0x1c   : > { %s1279_s17 = scalar_select %p316_p11, %s1165_s27, 1  ;;  %357 = vperm.xlu0 %1061, %v343_v2   ;;  %367 = vperm.xlu1 %1062, %v345_v3   ;;  %v346_v8 = vld [vmem:[%s1487_s2 + $0x18] sm:$0xff]  ;;  %v347_v10 = vld [vmem:[%s1487_s2 + $0x20] sm:$0xff]  ;;  %v348_v12 = vld [vmem:[%s1487_s2 + $0x28] sm:$0xff] }
  0x1d   : > { %v334_v9 = vld [vmem:[%s1486_s1 + $0x18] sm:$0xff]  ;;  %v335_v11 = vld [vmem:[%s1486_s1 + $0x20] sm:$0xff]  ;;  %v336_v13 = vld [vmem:[%s1486_s1 + $0x28] sm:$0xff] }
  0x1e   : > { %s879_s18 = sshll.u32 %s1279_s17, 2  ;;  %v349_v14 = vld [vmem:[%s1487_s2 + $0x30] sm:$0xff]  ;;  %v350_v16 = vld [vmem:[%s1487_s2 + $0x38] sm:$0xff]  ;;  %v351_v18 = vld [vmem:[%s1487_s2 + $0x40] sm:$0xff]  ;;  %s1396_s17 = scalar_lea.hbm %s1478_s5, %s898_s30 }
  0x1f   : > { %s322_s8 = scalar_lea.vmem %s1488_s0, %s879_s18  ;;  %v337_v15 = vld [vmem:[%s1486_s1 + $0x30] sm:$0xff]  ;;  %v338_v17 = vld [vmem:[%s1486_s1 + $0x38] sm:$0xff]  ;;  %v339_v19 = vld [vmem:[%s1486_s1 + $0x40] sm:$0xff]  ;;  %s329_s12 = scalar_lea.vmem %s1479_s6, %s879_s18 }
  0x20   : > { %v330_v4 = vld [vmem:[%s322_s8] sm:$0xf]  ;;  %362 = vperm.xlu0 %1061, %v344_v6   ;;  %372 = vperm.xlu1 %1062, %v346_v8   ;;  %v352_v20 = vld [vmem:[%s1487_s2 + $0x48] sm:$0xff]  ;;  %v353_v22 = vld [vmem:[%s1487_s2 + $0x50] sm:$0xff]  ;;  %s737_s0 = sshll.u32 %s315_s20, 4  ;;  %s1067_s30 = sshll.u32 %s1176_s23, 4  ;;  %s1405_s0 = int_to_ptr.vmem [resolvable:$true] %s737_s0  ;;  %s1068_s30 = int_to_ptr.vmem [resolvable:$false] %s1067_s30 }
  0x21   : > { %929 = vmatprep.subr.msk.mxu0 %vm452_vm1, %v330_v4  ;;  %v340_v21 = vld [vmem:[%s1486_s1 + $0x48] sm:$0xff]  ;;  %v341_v23 = vld [vmem:[%s1486_s1 + $0x50] sm:$0xff]  ;;  %v354_v24 = vld [vmem:[%s1487_s2 + $0x58] sm:$0xff]  ;;  %s1063_s2 = scalar_lea.vmem %s1398_s16, 32  ;;  %s1069_s8 = scalar_lea.vmem %s1068_s30, 64 }
  0x22   : > { %930 = vmatpush3.msk.msra.mxu0 %vm452_vm1, %v330_v4  ;;  %v342_v25 = vld [vmem:[%s1486_s1 + $0x58] sm:$0xff]  ;;  %s694_s1 = scalar_lea.sflag [#allocation3], %s1382_s21  ;;  %p1064_p12 = scmp.ne.s32.totalorder %s1398_s16, %s1063_s2 }
  0x23   : > { %932 = vmatmul.mubr.msk.f32.vlgmr.msra.gmra.mrb[0].mxu0 %vm415_vm0, %v332_v5  ;;  %p1070_p1 = scmp.lt.s32.totalorder %s1398_s16, %s1068_s30  ;;  %p1071_p2 = scmp.lt.s32.totalorder %s1069_s8, %s1063_s2 }
  0x24   : > { %934 = vmatprep.mubr.msk.f32.mxu0 %vm415_vm0, %v333_v7  ;;  %377 = vperm.xlu0 %1061, %v347_v10   ;;  %p1065_p13 = pnand %p1064_p12, %p1258_p4 }
  0x25   : > { %382 = vperm.xlu1 %1062, %v348_v12   ;;  %p1072_p3 = por %p1071_p2, %p1070_p1 }
  0x26   : > { %p1066_p0 = pneg %p1065_p13 }
  0x27   : > { %935 = vmatmul.mubr.msk.f32.gmra.mrb[2].mxu0 %vm415_vm0, %v334_v9 }
  0x28   : > { %937 = vmatprep.mubr.msk.f32.mxu0 %vm415_vm0, %v335_v11  ;;  %387 = vperm.xlu0 %1061, %v349_v14   ;;  %p1073_p5 = pnand %p1072_p3, %p1066_p0 }
  0x29   : > { %392 = vperm.xlu1 %1062, %v350_v16  }
  0x2b   : > { %938 = vmatmul.mubr.msk.f32.gmra.mrb[4].mxu0 %vm415_vm0, %v336_v13 }
  0x2c   : > { %940 = vmatprep.mubr.msk.f32.mxu0 %vm415_vm0, %v337_v15  ;;  %397 = vperm.xlu0 %1061, %v351_v18  }
  0x2d   : > { %402 = vperm.xlu1 %1062, %v352_v20  }
  0x2f   : > { %941 = vmatmul.mubr.msk.f32.gmra.mrb[6].mxu0 %vm415_vm0, %v338_v17 }
  0x30   : > { %943 = vmatprep.mubr.msk.f32.mxu0 %vm415_vm0, %v339_v19  ;;  %407 = vperm.xlu0 %1061, %v353_v22   ;;  %v594_v19 = vld [vmem:[%s1476_s3 + $0x8] sm:$0xff] }
  0x31   : > { %412 = vperm.xlu1 %1062, %v354_v24  }
  0x33   : > { %944 = vmatmul.mubr.msk.f32.gmra.mrb[8].mxu0 %vm415_vm0, %v340_v21 }
  0x34   : > { %946 = vmatprep.mubr.msk.f32.mxu0 %vm415_vm0, %v341_v23  ;;  %599 = vperm.xlu0 %1061, %v595_v26  }
  0x35   : > { %604 = vperm.xlu1 %1062, %v596_v27  }
  0x37   : > { %947 = vmatmul.mubr.msk.f32.gmra.mrb[10].mxu0 %vm415_vm0, %v342_v25 }
  0x9b   : > { %v368_v29 = vpop.permute.xlu1 %367  ;;  %v358_v30 = vpop.permute.xlu0 %357 }
  0x9f   : > { %v373_v31 = vpop.permute.xlu1 %372  ;;  %v363_v32 = vpop.permute.xlu0 %362 }
  0xa3   : > { %v378_v38 = vpop.permute.xlu0 %377 }
  0xa4   : > { %v383_v36 = vpop.permute.xlu1 %382 }
  0xa7   : > { %v388_v50 = vpop.permute.xlu0 %387 }
  0xa8   : > { %v393_v47 = vpop.permute.xlu1 %392 }
  0xab   : > { %v398_v63 = vpop.permute.xlu0 %397 }
  0xac   : > { %v403_v60 = vpop.permute.xlu1 %402 }
  0xaf   : > { %v408_v11 = vpop.permute.xlu0 %407 }
  0xb0   : > { %v413_v8 = vpop.permute.xlu1 %412 }
  0xb3   : > { %v600_v22 = vpop.permute.xlu0 %599 }
  0xb4   : > { %v605_v20 = vpop.permute.xlu1 %604 }
  0xf6   : > { %v933_v33 = vpop.f32.mrb[0].mxu0 }
  0xf7   : > { %v528_v34 = vadd.f32 %v933_v33, %v363_v32  ;;  %v522_v35 = vpop.f32.mrb[1].mxu0 }
  0xf8   : > { %v523_v37 = vadd.f32 %v522_v35, %v358_v30 }
  0xf9   : > { %v582_v39 = vmax.f32 %v528_v34, 0.0 }
  0xfa   : > { %v581_v40 = vmax.f32 %v523_v37, 0.0  ;;  %v936_v41 = vpop.f32.mrb[2].mxu0 }
  0xfb   : > { %v538_v42 = vadd.f32 %v936_v41, %v373_v31  ;;  %v532_v43 = vpop.f32.mrb[3].mxu0 }
  0xfc   : > { %v533_v44 = vadd.f32 %v532_v43, %v368_v29  ;;  %v976_v45 = vpack.c.bf16 %v582_v39, %v581_v40 }
  0xfd   : > { %v584_v46 = vmax.f32 %v538_v42, 0.0 }
  0xfe   : > { %v583_v48 = vmax.f32 %v533_v44, 0.0  ;;  %v939_v49 = vpop.f32.mrb[4].mxu0  ;;  %977 = vmatprep.subr.bf16.mxu1 %v976_v45 }
  0xff   : > { %v548_v51 = vadd.f32 %v939_v49, %v383_v36  ;;  %v542_v52 = vpop.f32.mrb[5].mxu0  ;;  %979 = vmatpush3.bf16.msra.mxu1 %v976_v45 }
 0x100   : > { %v980_v53 = vpack.c.bf16 %v584_v46, %v583_v48  ;;  %v543_v54 = vadd.f32 %v542_v52, %v378_v38 }
 0x101   : > { %v586_v55 = vmax.f32 %v548_v51, 0.0 }
 0x102   : > { %v585_v56 = vmax.f32 %v543_v54, 0.0  ;;  %v942_v57 = vpop.f32.mrb[6].mxu0  ;;  %981 = vmatprep.subr.bf16.mxu1 %v980_v53 }
 0x103   : > { %v558_v58 = vadd.f32 %v942_v57, %v393_v47  ;;  %v552_v59 = vpop.f32.mrb[7].mxu0  ;;  %983 = vmatpush3.bf16.msra.mxu1 %v980_v53 }
 0x104   : > { %v984_v61 = vpack.c.bf16 %v586_v55, %v585_v56  ;;  %v553_v62 = vadd.f32 %v552_v59, %v388_v50 }
 0x105   : > { %v588_v0 = vmax.f32 %v558_v58, 0.0 }
 0x106   : > { %v587_v1 = vmax.f32 %v553_v62, 0.0  ;;  %v945_v2 = vpop.f32.mrb[8].mxu0  ;;  %985 = vmatprep.subr.bf16.mxu1 %v984_v61 }
 0x107   : > { %v568_v3 = vadd.f32 %v945_v2, %v403_v60  ;;  %v562_v4 = vpop.f32.mrb[9].mxu0  ;;  %987 = vmatpush3.bf16.msra.mxu1 %v984_v61 }
 0x108   : > { %v988_v5 = vpack.c.bf16 %v588_v0, %v587_v1  ;;  %v563_v6 = vadd.f32 %v562_v4, %v398_v63 }
 0x109   : > { %v590_v7 = vmax.f32 %v568_v3, 0.0 }
 0x10a   : > { %v589_v9 = vmax.f32 %v563_v6, 0.0  ;;  %v948_v10 = vpop.f32.mrb[10].mxu0  ;;  %989 = vmatprep.subr.bf16.mxu1 %v988_v5 }
 0x10b   : > { %v578_v12 = vadd.f32 %v948_v10, %v413_v8  ;;  %v572_v13 = vpop.f32.mrb[11].mxu0  ;;  %991 = vmatpush3.bf16.msra.mxu1 %v988_v5 }
 0x10c   : > { %v992_v14 = vpack.c.bf16 %v590_v7, %v589_v9  ;;  %v573_v15 = vadd.f32 %v572_v13, %v408_v11 }
 0x10d   : > { %v592_v16 = vmax.f32 %v578_v12, 0.0 }
 0x10e   : > { %v591_v17 = vmax.f32 %v573_v15, 0.0  ;;  %993 = vmatprep.subr.bf16.mxu1 %v992_v14 }
 0x10f   : > { %995 = vmatpush3.bf16.msra.mxu1 %v992_v14 }
 0x110   : > { %v996_v18 = vpack.c.bf16 %v592_v16, %v591_v17 }
 0x112   : > { %997 = vmatprep.subr.bf16.mxu1 %v996_v18 }
 0x113   : > { %999 = vmatpush3.bf16.msra.mxu1 %v996_v18 }
 0x116   : > { %974 = vmatmul.mubr.msk.f32.vlgmr.msra.gmra.mrb[0].mxu1 %vm607_vm2, %v594_v19 }
 0x1e9   : > { %v975_v21 = vpop.f32.mrb[0].mxu1 }
 0x1ea   : > { %v686_v23 = vadd.f32 %v975_v21, %v605_v20  ;;  %v680_v24 = vpop.f32.mrb[1].mxu1 }
 0x1eb   : > { %v681_v25 = vadd.f32 %v680_v24, %v600_v22 }
 0x1ec   : > { %692 = vst [vmem:[%s315_s20 + $0x3] sm:$0x1] %v686_v23 }
 0x1ed   : > { %690 = vst [vmem:[%s329_s12 - $0x2] sm:$0x1c] %v681_v25  ;;  %691 = vst [vmem:[%s315_s20 - $0x5] sm:$0xe0] %v681_v25 }
 0x1ee   : > { %689 = vst [vmem:[%s299_s15] sm:$0x3] %v681_v25 }
 0x1ef   : > { %1076 = shalt.err (!%p1073_p5)
}
 0x1f0   : > { %s1077_s10 = scalar_lea.hbm %s1396_s17, 32  ;;  %s1081_s19 = scalar_lea.hbm %s1478_s5, 64 }
 0x1f1   : > { %p1078_p6 = scmp.ne.s32.totalorder %s1396_s17, %s1077_s10  ;;  %p1082_p10 = scmp.lt.u32.totalorder %s1396_s17, %s1478_s5 }
 0x1f2   : > { %p1083_p11 = scmp.lt.u32.totalorder %s1081_s19, %s1077_s10  ;;  %p1085_p13 = scmp.lt.u32.totalorder %s1077_s10, %s1396_s17 }
 0x1f3   : > { %p1079_p7 = pnand %p1078_p6, %p1258_p4 }
 0x1f4   : > { %p1084_p12 = por %p1083_p11, %p1082_p10 }
 0x1f5   : > { %p1080_p9 = pneg %p1079_p7 }
 0x1f6   : > { %p1086_p0 = por %p1085_p13, %p1084_p12 }
 0x1f8   : > { %p1087_p1 = pnand %p1086_p0, %p1080_p9 }
 0x1fa   : > { %1090 = shalt.err (!%p1087_p1)
}
 0x1fb   : > { %1000 = dma.vmem_to_hbm [thread:$0]  (%p1258_p4), %s1398_s16, 32, %s1396_s17, %s694_s1  }
 0x1fc   : > { %s706_s27 = scalar_lea.sflag [#allocation5], %s1382_s21  ;;  %s1091_s2 = scalar_lea.vmem %s1405_s0, 64 }
 0x1fd   : > { %p1092_p2 = scmp.ne.s32.totalorder %s1405_s0, %s1091_s2  ;;  %s1177_s23 = smov [#allocation4]  }
 0x1fe   : > { %s1095_s30 = sshll.u32 %s1177_s23, 4  ;;  %s1096_s30 = int_to_ptr.vmem [resolvable:$false] %s1095_s30 }
 0x1ff   : > { %p1093_p3 = pnand %p1092_p2, %p1258_p4  ;;  %s1097_s8 = scalar_lea.vmem %s1096_s30, 128 }
 0x200   : > { %p1098_p6 = scmp.lt.s32.totalorder %s1405_s0, %s1096_s30  ;;  %p1099_p7 = scmp.lt.s32.totalorder %s1097_s8, %s1091_s2 }
 0x201   : > { %p1094_p5 = pneg %p1093_p3 }
 0x202   : > { %p1100_p9 = por %p1099_p7, %p1098_p6 }
 0x204   : > { %p1101_p10 = pnand %p1100_p9, %p1094_p5 }
 0x206   : > { %1104 = shalt.err (!%p1101_p10)
}
 0x207   : > { %s1105_s21 = scalar_lea.hbm %s1403_s22, 64  ;;  %s1109_s1 = scalar_lea.hbm %s1480_s7, 128 }
 0x208   : > { %p1106_p11 = scmp.ne.s32.totalorder %s1403_s22, %s1105_s21  ;;  %p1110_p0 = scmp.lt.u32.totalorder %s1403_s22, %s1480_s7 }
 0x209   : > { %p1111_p1 = scmp.lt.u32.totalorder %s1109_s1, %s1105_s21  ;;  %p1113_p3 = scmp.lt.u32.totalorder %s1105_s21, %s1403_s22 }
 0x20a   : > { %p1107_p12 = pnand %p1106_p11, %p1258_p4 }
 0x20b   : > { %p1112_p2 = por %p1111_p1, %p1110_p0 }
 0x20c   : > { %p1108_p13 = pneg %p1107_p12 }
 0x20d   : > { %p1114_p5 = por %p1113_p3, %p1112_p2 }
 0x20f   : > { %p1115_p6 = pnand %p1114_p5, %p1108_p13 }
 0x211   : > { %1118 = shalt.err (!%p1115_p6)
}
 0x212   : > { %1001 = dma.vmem_to_hbm [thread:$0]  (%p1258_p4), %s1405_s0, 64, %s1403_s22, %s706_s27  }
 0x213 PF: > { %p1011_p7 = scmp.ge.s32.totalorder %s1173_s29, 2  ;;  %s749_s15 = sand.u32 1, %s1153_s24  }
 0x214   : > { %s750_s19 = scalar_lea.sflag [#allocation3], %s749_s15 }
 0x215   : > { %p1005_p9 = pnand %p1011_p7, %p1265_p8 }
 0x217   : > { %1144 = dma.done.wait (!%p1005_p9), %s750_s19, 32  }
 0x218   : > { %1146 = vsyncadd (!%p1005_p9), %s750_s19, 4294967264  ;;  %s769_s20 = scalar_lea.sflag [#allocation5], %s749_s15 }
 0x219   : > { %1148 = dma.done.wait (!%p1005_p9), %s769_s20, 64  }
 0x21a   : > { %1150 = vsyncadd (!%p1005_p9), %s769_s20, 4294967232  ;;  %s24_s29 = sadd.s32 1, %s1173_s29   ;;  %s1489_s24 = smov %s1157_s25 }
 0x21b   : > { %p21_p10 = scmp.ge.s32.totalorder %s24_s29, 4   ;;  %s1490_s25 = smov %s1161_s26 }
 0x21c   : > { %s1491_s26 = smov %s1271_s14  ;;  %s1492_s27 = smov %s1169_s28 }
 0x21d   : > { %s1493_s28 = smov %s1495_s9  ;;  %23 = sbr.rel (!%p21_p10) target bundleno = 10 (0xa), region = 104 }
 0x224   :  { %774 = vsyncpa [#allocation3], 1 }
 0x225   :  { %776 = vsyncpa [#allocation3 + $0x1], 1 }
 0x226   :  { %777 = vsyncpa [#allocation5], 1 }
 0x227   :  { %779 = vsyncpa [#allocation5 + $0x1], 1 }

</bundles_post_ra>
